<compile_context>
chip_gen: v6e
topology: v6e:2x2x1
jax: 0.10.0
libtpu: 0.0.40
codegen_flags: <defaults>
</compile_context>

<pallas_src>
import math

import jax
import jax.numpy as jnp
from jax.experimental import pallas as pl
from jax.experimental.pallas import tpu as pltpu


def _leaky_esn_seq_kernel(leaky_ref,      # SMEM (1,) f32        leaky rate a
                          x_ref,          # (1, B, Din)   bf16   input at step t
                          win_ref,        # (Din, Dres)   bf16   VMEM-resident
                          wres_ref,       # (Dres, Dres)  bf16   VMEM-resident
                          state0_ref,     # (B, Dres)     f32    initial state
                          effb_ref,       # (1, Dres)     f32    a*bias + noise
                          wout_ref,       # (Dres, DoutP) bf16   readout weight
                          bout_ref,       # (1, DoutP)    f32    readout bias
                          y_ref,          # (1, B, DoutP) f32    output at step t
                          state_out_ref,  # (B, Dres)     f32    final state
                          state_vmem):    # scratch (B, Dres) f32 carried state
    t = pl.program_id(0)
    a = leaky_ref[0]

    @pl.when(t == 0)
    def _():
        state_vmem[...] = state0_ref[...]

    state = state_vmem[...]                      # (B, Dres) f32
    x = x_ref[0]                                 # (B, Din)  bf16

    # tilde_x = x @ W_in + state @ W_res + bias   (bias/noise folded into effb)
    xin = jnp.dot(x, win_ref[...], preferred_element_type=jnp.float32)
    rec = jnp.dot(state.astype(wres_ref.dtype), wres_ref[...],
                  preferred_element_type=jnp.float32)

    # new_state = tanh((1-a)*state + a*tilde_x + noise)
    #           = tanh((1-a)*state + a*(x@W_in + state@W_res) + (a*bias + noise))
    new_state = jnp.tanh((1.0 - a) * state + a * (xin + rec) + effb_ref[...])
    state_vmem[...] = new_state

    # readout: Linear(size_res, size_out); W_out pre-transposed & lane-padded
    y = jnp.dot(new_state.astype(wout_ref.dtype), wout_ref[...],
                preferred_element_type=jnp.float32) + bout_ref[...]
    y_ref[0] = y.astype(y_ref.dtype)

    @pl.when(t == pl.num_programs(0) - 1)
    def _():
        state_out_ref[...] = new_state.astype(state_out_ref.dtype)


def leaky_esn_forward(x_seq, w_in, state, w_res, bias, noise, w_out, b_out,
                      leaky):
    """Runs T leaky-ESN steps in a single pallas_call.

    x_seq : (T, B, Din) f32
    w_in  : (Din, Dres) f32
    state : (1, Dres) or (B, Dres) initial reservoir state
    w_res : (Dres, Dres) f32
    bias, noise : (1, Dres) f32
    w_out : (Dres, Dout) f32  (already transposed from PyTorch (out, in))
    b_out : (1, Dout) f32
    Returns (y_seq (T, B, Dout) f32, final_state (B, Dres) f32).
    """
    T, B, Din = x_seq.shape
    Dres = w_res.shape[0]
    Dout = w_out.shape[1]

    # Lane-dense readout: pad Dout up to a multiple of 128 lanes.
    DoutP = ((Dout + 127) // 128) * 128
    w_out_p = jnp.pad(w_out, ((0, 0), (0, DoutP - Dout)))
    b_out_p = jnp.pad(b_out, ((0, 0), (0, DoutP - Dout))).astype(jnp.float32)

    # Fold a*bias + noise into one broadcast vector (computed once, outside).
    eff_bias = (jnp.float32(leaky) * bias + noise).reshape(1, Dres)
    eff_bias = eff_bias.astype(jnp.float32)

    # Broadcast the initial state over the batch (PyTorch broadcasts it too).
    state0 = jnp.broadcast_to(state.reshape(-1, Dres),
                              (B, Dres)).astype(jnp.float32)

    # bf16 matmul operands; f32 accumulation happens inside the kernel.
    x_bf = x_seq.astype(jnp.bfloat16)
    w_in_bf = w_in.astype(jnp.bfloat16)
    w_res_bf = w_res.astype(jnp.bfloat16)
    w_out_bf = w_out_p.astype(jnp.bfloat16)

    leaky_arr = jnp.asarray(leaky, dtype=jnp.float32).reshape(1)

    y_p, final_state = pl.pallas_call(
        _leaky_esn_seq_kernel,
        out_shape=(
            jax.ShapeDtypeStruct((T, B, DoutP), jnp.float32),
            jax.ShapeDtypeStruct((B, Dres), jnp.float32),
        ),
        grid=(T,),
        in_specs=[
            pl.BlockSpec(memory_space=pltpu.MemorySpace.SMEM),    # leaky
            pl.BlockSpec((1, B, Din), lambda t: (t, 0, 0)),       # x[t] streamed
            pl.BlockSpec((Din, Dres), lambda t: (0, 0)),          # W_in  resident
            pl.BlockSpec((Dres, Dres), lambda t: (0, 0)),         # W_res resident
            pl.BlockSpec((B, Dres), lambda t: (0, 0)),            # initial state
            pl.BlockSpec((1, Dres), lambda t: (0, 0)),            # a*bias + noise
            pl.BlockSpec((Dres, DoutP), lambda t: (0, 0)),        # W_out resident
            pl.BlockSpec((1, DoutP), lambda t: (0, 0)),           # b_out
        ],
        out_specs=(
            pl.BlockSpec((1, B, DoutP), lambda t: (t, 0, 0)),     # y[t]
            pl.BlockSpec((B, Dres), lambda t: (0, 0)),            # final state
        ),
        scratch_shapes=[pltpu.VMEM((B, Dres), jnp.float32)],
        compiler_params=pltpu.CompilerParams(
            # Recurrence over time -> the grid axis must be sequential.
            dimension_semantics=("arbitrary",),
        ),
    )(leaky_arr, x_bf, w_in_bf, w_res_bf, state0, eff_bias, w_out_bf, b_out_p)

    return y_p[..., :Dout], final_state


def _init_params(key, size_in, size_res, size_out):
    """Deterministic synthetic init mirroring the PyTorch __init__ shapes.

    Note: in the reference, weight_res's adjacency mask is overwritten by the
    second kaiming_uniform_ call, so weight_res ends up dense kaiming-uniform.
    """
    k_in, k_res, k_b, k_noise, k_wout, k_bout = jax.random.split(key, 6)

    # kaiming_uniform_(a=sqrt(5)) on 2D -> U(-1/sqrt(fan_in), +1/sqrt(fan_in))
    bound_in = 1.0 / math.sqrt(size_res)   # fan_in of (size_in, size_res)
    w_in = jax.random.uniform(k_in, (size_in, size_res), jnp.float32,
                              -bound_in, bound_in)

    bound_res = 1.0 / math.sqrt(size_res)
    w_res = jax.random.uniform(k_res, (size_res, size_res), jnp.float32,
                               -bound_res, bound_res)

    bias = jax.random.uniform(k_b, (1, size_res), jnp.float32,
                              -bound_in, bound_in)

    state = jnp.zeros((1, size_res), jnp.float32)

    # noise buffer: U(0, 1e-3) (reference's _reset_noise range)
    noise = jax.random.uniform(k_noise, (1, size_res), jnp.float32, 0.0, 1e-3)

    # nn.Linear(size_res, size_out)
    bound_lin = 1.0 / math.sqrt(size_res)
    w_out_pt = jax.random.uniform(k_wout, (size_out, size_res), jnp.float32,
                                  -bound_lin, bound_lin)
    b_out = jax.random.uniform(k_bout, (1, size_out), jnp.float32,
                               -bound_lin, bound_lin)
    w_out = w_out_pt.T                     # (size_res, size_out) for row-major dot

    return w_in, w_res, bias, state, noise, w_out, b_out


def _reference_seq(x_seq, w_in, state, w_res, bias, noise, w_out, b_out, leaky):
    """Pure-f32 JAX reference: PyTorch forward() applied T times (recurrent)."""
    ys = []
    st = state                                       # (1, Dres) -> (B, Dres)
    for t in range(x_seq.shape[0]):
        tilde = x_seq[t] @ w_in + st @ w_res + bias
        st = jnp.tanh((1.0 - leaky) * st + leaky * tilde + noise)
        ys.append(st @ w_out + b_out)
    return jnp.stack(ys, axis=0), st


if __name__ == "__main__":
    size_in, size_res, size_out = 16, 128, 8
    batch, T = 8, 6
    leaky = 0.3

    key = jax.random.PRNGKey(0)
    k_params, k_x = jax.random.split(key)
    w_in, w_res, bias, state, noise, w_out, b_out = _init_params(
        k_params, size_in, size_res, size_out)
    x_seq = jax.random.normal(k_x, (T, batch, size_in), jnp.float32)

    y_seq, final_state = leaky_esn_forward(
        x_seq, w_in, state, w_res, bias, noise, w_out, b_out, leaky)
    jax.block_until_ready((y_seq, final_state))

    y_ref, state_ref = _reference_seq(
        x_seq, w_in, state, w_res, bias, noise, w_out, b_out, leaky)

    # bf16 matmul operands -> relaxed tolerance vs the f32 reference.
    assert y_seq.shape == (T, batch, size_out)
    assert final_state.shape == (batch, size_res)
    assert jnp.allclose(y_seq, y_ref, atol=2e-2, rtol=2e-2)
    assert jnp.allclose(final_state, state_ref, atol=2e-2, rtol=2e-2)

    print("KERNEL_OK")
</pallas_src>

<mosaic_0001>
module attributes {stable_mosaic.version = 11 : i64} {
  func.func @_leaky_esn_seq_kernel(%arg0: i32, %arg1: memref<1xf32, #tpu.memory_space<smem>>, %arg2: memref<1x8x16xbf16, #tpu.memory_space<vmem>>, %arg3: memref<16x128xbf16, #tpu.memory_space<vmem>>, %arg4: memref<128x128xbf16, #tpu.memory_space<vmem>>, %arg5: memref<8x128xf32, #tpu.memory_space<vmem>>, %arg6: memref<1x128xf32, #tpu.memory_space<vmem>>, %arg7: memref<128x128xbf16, #tpu.memory_space<vmem>>, %arg8: memref<1x128xf32, #tpu.memory_space<vmem>>, %arg9: memref<1x8x128xf32, #tpu.memory_space<vmem>>, %arg10: memref<8x128xf32, #tpu.memory_space<vmem>>, %arg11: memref<8x128xf32, #tpu.memory_space<vmem>>) attributes {dimension_semantics = [#tpu.dimension_semantics<arbitrary>], iteration_bounds = array<i64: 6>, scalar_prefetch = 0 : i64, scratch_operands = 1 : i64, tpu.core_type = #tpu.core_type<tc>, window_params = [{transform_indices = @transform_0, window_bounds = array<i64: 1>}, {transform_indices = @transform_1, window_bounds = array<i64: 1, 8, 16>}, {pipeline_mode = #tpu.pipeline_mode<synchronous>, transform_indices = @transform_2, window_bounds = array<i64: 16, 128>}, {pipeline_mode = #tpu.pipeline_mode<synchronous>, transform_indices = @transform_3, window_bounds = array<i64: 128, 128>}, {pipeline_mode = #tpu.pipeline_mode<synchronous>, transform_indices = @transform_4, window_bounds = array<i64: 8, 128>}, {pipeline_mode = #tpu.pipeline_mode<synchronous>, transform_indices = @transform_5, window_bounds = array<i64: 1, 128>}, {pipeline_mode = #tpu.pipeline_mode<synchronous>, transform_indices = @transform_6, window_bounds = array<i64: 128, 128>}, {pipeline_mode = #tpu.pipeline_mode<synchronous>, transform_indices = @transform_7, window_bounds = array<i64: 1, 128>}, {transform_indices = @transform_8, window_bounds = array<i64: 1, 8, 128>}, {pipeline_mode = #tpu.pipeline_mode<synchronous>, transform_indices = @transform_9, window_bounds = array<i64: 8, 128>}]} {
    %c0 = arith.constant 0 : index
    %0 = memref.load %arg1[%c0] : memref<1xf32, #tpu.memory_space<smem>>
    %c0_i32 = arith.constant 0 : i32
    %1 = arith.cmpi eq, %arg0, %c0_i32 : i32
    %2 = arith.extui %1 : i1 to i32
    %c0_i32_0 = arith.constant 0 : i32
    %3 = arith.cmpi ne, %2, %c0_i32_0 : i32
    scf.if %3 {
      %c0_25 = arith.constant 0 : index
      %c0_26 = arith.constant 0 : index
      %36 = vector.load %arg5[%c0_25, %c0_26] : memref<8x128xf32, #tpu.memory_space<vmem>>, vector<8x128xf32>
      %c0_27 = arith.constant 0 : index
      %c0_28 = arith.constant 0 : index
      %37 = vector.load %arg11[%c0_27, %c0_28] : memref<8x128xf32, #tpu.memory_space<vmem>>, vector<8x128xf32>
      tpu.vector_store %arg11[%c0_27, %c0_28], %36 {strides = array<i32>} : memref<8x128xf32, #tpu.memory_space<vmem>>, vector<8x128xf32>,
    } else {
    }
    %c0_1 = arith.constant 0 : index
    %c0_2 = arith.constant 0 : index
    %4 = vector.load %arg11[%c0_1, %c0_2] : memref<8x128xf32, #tpu.memory_space<vmem>>, vector<8x128xf32>
    %c0_3 = arith.constant 0 : index
    %c0_4 = arith.constant 0 : index
    %c0_5 = arith.constant 0 : index
    %5 = vector.load %arg2[%c0_3, %c0_4, %c0_5] : memref<1x8x16xbf16, #tpu.memory_space<vmem>>, vector<1x8x16xbf16>
    %6 = vector.shape_cast %5 : vector<1x8x16xbf16> to vector<8x16xbf16>
    %c0_6 = arith.constant 0 : index
    %c0_7 = arith.constant 0 : index
    %7 = vector.load %arg3[%c0_6, %c0_7] : memref<16x128xbf16, #tpu.memory_space<vmem>>, vector<16x128xbf16>
    %cst = arith.constant dense<0.000000e+00> : vector<8x128xf32>
    %8 = tpu.matmul %6, %7, %cst {dimension_numbers = #tpu.dot_dimension_numbers<[1], [0], [0], [1], [0, 0, 1, 1], [], []>} : vector<8x16xbf16>, vector<16x128xbf16>, vector<8x128xf32> -> vector<8x128xf32>
    %9 = arith.truncf %4 : vector<8x128xf32> to vector<8x128xbf16>
    %c0_8 = arith.constant 0 : index
    %c0_9 = arith.constant 0 : index
    %10 = vector.load %arg4[%c0_8, %c0_9] : memref<128x128xbf16, #tpu.memory_space<vmem>>, vector<128x128xbf16>
    %cst_10 = arith.constant dense<0.000000e+00> : vector<8x128xf32>
    %11 = tpu.matmul %9, %10, %cst_10 {dimension_numbers = #tpu.dot_dimension_numbers<[1], [0], [0], [1], [0, 0, 1, 1], [], []>} : vector<8x128xbf16>, vector<128x128xbf16>, vector<8x128xf32> -> vector<8x128xf32>
    %cst_11 = arith.constant 1.000000e+00 : f32
    %12 = arith.subf %cst_11, %0 : f32
    %13 = vector.broadcast %12 : f32 to vector<8x128xf32>
    %14 = arith.mulf %13, %4 : vector<8x128xf32>
    %15 = arith.addf %8, %11 : vector<8x128xf32>
    %16 = vector.broadcast %0 : f32 to vector<8x128xf32>
    %17 = arith.mulf %16, %15 : vector<8x128xf32>
    %18 = arith.addf %14, %17 : vector<8x128xf32>
    %c0_12 = arith.constant 0 : index
    %c0_13 = arith.constant 0 : index
    %19 = vector.load %arg6[%c0_12, %c0_13] : memref<1x128xf32, #tpu.memory_space<vmem>>, vector<1x128xf32>
    %20 = vector.broadcast %19 : vector<1x128xf32> to vector<8x128xf32>
    %21 = arith.addf %18, %20 : vector<8x128xf32>
    %22 = math.tanh %21 : vector<8x128xf32>
    %c0_14 = arith.constant 0 : index
    %c0_15 = arith.constant 0 : index
    %23 = vector.load %arg11[%c0_14, %c0_15] : memref<8x128xf32, #tpu.memory_space<vmem>>, vector<8x128xf32>
    tpu.vector_store %arg11[%c0_14, %c0_15], %22 {strides = array<i32>} : memref<8x128xf32, #tpu.memory_space<vmem>>, vector<8x128xf32>,
    %24 = arith.truncf %22 : vector<8x128xf32> to vector<8x128xbf16>
    %c0_16 = arith.constant 0 : index
    %c0_17 = arith.constant 0 : index
    %25 = vector.load %arg7[%c0_16, %c0_17] : memref<128x128xbf16, #tpu.memory_space<vmem>>, vector<128x128xbf16>
    %cst_18 = arith.constant dense<0.000000e+00> : vector<8x128xf32>
    %26 = tpu.matmul %24, %25, %cst_18 {dimension_numbers = #tpu.dot_dimension_numbers<[1], [0], [0], [1], [0, 0, 1, 1], [], []>} : vector<8x128xbf16>, vector<128x128xbf16>, vector<8x128xf32> -> vector<8x128xf32>
    %c0_19 = arith.constant 0 : index
    %c0_20 = arith.constant 0 : index
    %27 = vector.load %arg8[%c0_19, %c0_20] : memref<1x128xf32, #tpu.memory_space<vmem>>, vector<1x128xf32>
    %28 = vector.broadcast %27 : vector<1x128xf32> to vector<8x128xf32>
    %29 = arith.addf %26, %28 : vector<8x128xf32>
    %c0_21 = arith.constant 0 : index
    %c0_22 = arith.constant 0 : index
    %c0_23 = arith.constant 0 : index
    %30 = vector.load %arg9[%c0_21, %c0_22, %c0_23] : memref<1x8x128xf32, #tpu.memory_space<vmem>>, vector<1x8x128xf32>
    %31 = vector.shape_cast %30 : vector<1x8x128xf32> to vector<8x128xf32>
    %32 = vector.shape_cast %29 : vector<8x128xf32> to vector<1x8x128xf32>
    tpu.vector_store %arg9[%c0_21, %c0_22, %c0_23], %32 {strides = array<i32>} : memref<1x8x128xf32, #tpu.memory_space<vmem>>, vector<1x8x128xf32>,
    %c5_i32 = arith.constant 5 : i32
    %33 = arith.cmpi eq, %arg0, %c5_i32 : i32
    %34 = arith.extui %33 : i1 to i32
    %c0_i32_24 = arith.constant 0 : i32
    %35 = arith.cmpi ne, %34, %c0_i32_24 : i32
    scf.if %35 {
      %c0_25 = arith.constant 0 : index
      %c0_26 = arith.constant 0 : index
      %36 = vector.load %arg10[%c0_25, %c0_26] : memref<8x128xf32, #tpu.memory_space<vmem>>, vector<8x128xf32>
      tpu.vector_store %arg10[%c0_25, %c0_26], %22 {strides = array<i32>} : memref<8x128xf32, #tpu.memory_space<vmem>>, vector<8x128xf32>,
    } else {
    }
    return
  }
  func.func @transform_0(%arg0: i32) -> i32 {
    %c0_i32 = arith.constant 0 : i32
    %c0_i32_0 = arith.constant 0 : i32
    return %c0_i32 : i32
  }
  func.func @transform_1(%arg0: i32) -> (i32, i32, i32) {
    %c0_i32 = arith.constant 0 : i32
    %c0_i32_0 = arith.constant 0 : i32
    %c0_i32_1 = arith.constant 0 : i32
    return %arg0, %c0_i32, %c0_i32_0 : i32, i32, i32
  }
  func.func @transform_2(%arg0: i32) -> (i32, i32) {
    %c0_i32 = arith.constant 0 : i32
    %c0_i32_0 = arith.constant 0 : i32
    %c0_i32_1 = arith.constant 0 : i32
    return %c0_i32, %c0_i32_0 : i32, i32
  }
  func.func @transform_3(%arg0: i32) -> (i32, i32) {
    %c0_i32 = arith.constant 0 : i32
    %c0_i32_0 = arith.constant 0 : i32
    %c0_i32_1 = arith.constant 0 : i32
    return %c0_i32, %c0_i32_0 : i32, i32
  }
  func.func @transform_4(%arg0: i32) -> (i32, i32) {
    %c0_i32 = arith.constant 0 : i32
    %c0_i32_0 = arith.constant 0 : i32
    %c0_i32_1 = arith.constant 0 : i32
    return %c0_i32, %c0_i32_0 : i32, i32
  }
  func.func @transform_5(%arg0: i32) -> (i32, i32) {
    %c0_i32 = arith.constant 0 : i32
    %c0_i32_0 = arith.constant 0 : i32
    %c0_i32_1 = arith.constant 0 : i32
    return %c0_i32, %c0_i32_0 : i32, i32
  }
  func.func @transform_6(%arg0: i32) -> (i32, i32) {
    %c0_i32 = arith.constant 0 : i32
    %c0_i32_0 = arith.constant 0 : i32
    %c0_i32_1 = arith.constant 0 : i32
    return %c0_i32, %c0_i32_0 : i32, i32
  }
  func.func @transform_7(%arg0: i32) -> (i32, i32) {
    %c0_i32 = arith.constant 0 : i32
    %c0_i32_0 = arith.constant 0 : i32
    %c0_i32_1 = arith.constant 0 : i32
    return %c0_i32, %c0_i32_0 : i32, i32
  }
  func.func @transform_8(%arg0: i32) -> (i32, i32, i32) {
    %c0_i32 = arith.constant 0 : i32
    %c0_i32_0 = arith.constant 0 : i32
    %c0_i32_1 = arith.constant 0 : i32
    return %arg0, %c0_i32, %c0_i32_0 : i32, i32, i32
  }
  func.func @transform_9(%arg0: i32) -> (i32, i32) {
    %c0_i32 = arith.constant 0 : i32
    %c0_i32_0 = arith.constant 0 : i32
    %c0_i32_1 = arith.constant 0 : i32
    return %c0_i32, %c0_i32_0 : i32, i32
  }
}

</mosaic_0001>

<bundles_post_ra>
// kernel: tpu_custom_call.1
= control target key start
LH: loop header
LB: loop body
LE: loop exit
PB: predicated region body
PF: predicated region fallthrough
CT: control target
= control target key end

     0   :  { %s1612_s0 = inlined_call_operand.<no memory space> [shape: f32[1], index: 0, kind: input, shape index: {}]   ;;  %s1613_s1 = inlined_call_operand.hbm [shape: bf16[6,8,16], index: 1, kind: input, shape index: {}]   ;;  %s1614_s2 = inlined_call_operand.hbm [shape: bf16[16,128], index: 2, kind: input, shape index: {}]   ;;  %s1615_s3 = inlined_call_operand.hbm [shape: bf16[128,128], index: 3, kind: input, shape index: {}]   ;;  %s1616_s4 = inlined_call_operand.hbm [shape: f32[8,128], index: 4, kind: input, shape index: {}]   ;;  %s1617_s5 = inlined_call_operand.vmem [shape: f32[1,128], index: 5, kind: input, shape index: {}]   ;;  %s1618_s6 = inlined_call_operand.hbm [shape: bf16[128,128], index: 6, kind: input, shape index: {}]   ;;  %s1619_s7 = inlined_call_operand.vmem [shape: f32[1,128], index: 7, kind: input, shape index: {}]   ;;  %s1620_s8 = inlined_call_operand.hbm [shape: f32[6,8,128], index: 8, kind: output, shape index: {0}]   ;;  %s1621_s9 = inlined_call_operand.hbm [shape: f32[8,128], index: 9, kind: output, shape index: {1}]  }
   0x1   :  { %1627 = sst [smem:[#allocation21_spill]] %s1614_s2 }
   0x2   :  { %1628 = sst [smem:[#allocation22_spill]] %s1615_s3 }
   0x3   :  { %1629 = sst [smem:[#allocation23_spill]] %s1616_s4 }
   0x4   :  { %15 = sst [smem:[#allocation3]] %s1612_s0 }
   0x5   :  { %16 = vsyncpa [#allocation5], 0 }
   0x6   :  { %18 = vsyncpa [#allocation5 + $0x1], 0 }
   0x7   :  { %19 = vsyncpa [#allocation8], 0 }
   0x8   :  { %20 = vsyncpa [#allocation11], 0 }
   0x9   :  { %21 = vsyncpa [#allocation6], 0 }
   0xa   :  { %23 = vsyncpa [#allocation6 + $0x1], 0 }
   0xb   :  { %24 = vsyncpa [#allocation15], 0  ;;  %s1374_s11 = smov 0   ;;  %s1376_s12 = smov 0  }
   0xc   :  { %s1378_s13 = smov 0   ;;  %s1380_s14 = smov 0  }
   0xd LB: > { %s1310_s0 = smov [#allocation7]   ;;  %s1395_s16 = sadd.s32 4294967295, %s1308_s14   ;;  %s1308_s14 = sphi %s1380_s14, %s1656_s14   ;;  %s1304_s13 = sphi %s1378_s13, %s1655_s13   ;;  %s1300_s12 = sphi %s1376_s12, %s1654_s12   ;;  %s1296_s11 = sphi %s1374_s11, %s1653_s11  }
   0xe   : > { %s270_s15 = sshll.u32 %s1310_s0, 4  ;;  %p850_p0 = scmp.ge.s32.totalorder %s1308_s14, 1  ;;  %s271_s15 = int_to_ptr.vmem [resolvable:$true] %s270_s15 }
   0xf   : > { %p1623_p1 = scmp.eq.s32.totalorder %s1395_s16, 0  ;;  %p255_p2 = scmp.lt.s32.totalorder %s1308_s14, 7 }
  0x10   : > { %s1311_s18 = smov [#allocation10]   ;;  %s1312_s21 = smov [#allocation9]  }
  0x11   : > { %p1401_p4 = pnand %p850_p0, %p255_p2  ;;  %s297_s19 = sshll.u32 %s1311_s18, 4  ;;  %s298_s19 = int_to_ptr.vmem [resolvable:$true] %s297_s19 }
  0x12   : > { %s283_s22 = sshll.u32 %s1312_s21, 4  ;;  %s1087_s23 = scalar_lea.vmem %s271_s15, 128  ;;  %s1413_s22 = int_to_ptr.vmem [resolvable:$true] %s283_s22 }
  0x13   : > { %s1630_s17 = scalar_select %p1401_p4, 1, 0 }
  0x14   : > { %p983_p5 = pneg %p1401_p4  ;;  %p1088_p8 = scmp.ne.s32.totalorder %s271_s15, %s1087_s23 }
  0x15   : > { %p1095_p11 = scmp.lt.s32.totalorder %s271_s15, %s271_s15  ;;  %p1096_p12 = scmp.lt.s32.totalorder %s1087_s23, %s1087_s23 }
  0x16   : > { %p1409_p6 = pnand %p983_p5, %p1623_p1 }
  0x17   : > { %p1097_p13 = por %p1096_p12, %p1095_p11 }
  0x18   : > { %p1078_p7 = pneg %p1409_p6 }
  0x1a   : > { %p1090_p9 = pnand %p1088_p8, %p1078_p7 }
  0x1c   : > { %p1091_p10 = pneg %p1090_p9 }
  0x1e   : > { %p1098_p0 = pnand %p1097_p13, %p1091_p10 }
  0x20   : > { %1101 = shalt.err (!%p1098_p0)
}
  0x21   : > { %s1313_s24 = smov 64   ;;  %s1314_s25 = smov 4  }
  0x22   : > { %s1632_s2 = sld [smem:[#allocation21_spill]]  ;;  %s1113_s28 = scalar_lea.vmem %s298_s19, 128 }
  0x23   : > { %p1114_p2 = scmp.ne.s32.totalorder %s298_s19, %s1113_s28  ;;  %p1121_p9 = scmp.lt.s32.totalorder %s298_s19, %s298_s19 }
  0x24   : > { %p1122_p10 = scmp.lt.s32.totalorder %s1113_s28, %s1113_s28 }
  0x25   : > { %p1116_p5 = pnand %p1114_p2, %p1078_p7 }
  0x26   : > { %p1123_p11 = por %p1122_p10, %p1121_p9 }
  0x27   : > { %p1117_p8 = pneg %p1116_p5 }
  0x28   : > { %986 = dma.hbm_to_vmem [thread:$0]  (!%p1409_p6), %s1632_s2, 128, %s271_s15, [#allocation8], %s1313_s24, %s1313_s24, %s1314_s25  }
  0x29   : > { %p1124_p12 = pnand %p1123_p11, %p1117_p8 }
  0x2b   : > { %1127 = shalt.err (!%p1124_p12)
}
  0x2c   : > { %s1633_s4 = sld [smem:[#allocation23_spill]]  ;;  %s1139_s10 = scalar_lea.vmem %s1413_s22, 1024 }
  0x2d   : > { %p1140_p13 = scmp.ne.s32.totalorder %s1413_s22, %s1139_s10  ;;  %p1147_p5 = scmp.lt.s32.totalorder %s1413_s22, %s1413_s22 }
  0x2e   : > { %p1148_p8 = scmp.lt.s32.totalorder %s1139_s10, %s1139_s10 }
  0x2f   : > { %p1142_p0 = pnand %p1140_p13, %p1078_p7 }
  0x30   : > { %p1149_p9 = por %p1148_p8, %p1147_p5 }
  0x31   : > { %p1143_p2 = pneg %p1142_p0 }
  0x32   : > { %992 = dma.hbm_to_vmem [thread:$0]  (!%p1409_p6), %s1633_s4, 128, %s298_s19, [#allocation11]  }
  0x33   : > { %p1150_p10 = pnand %p1149_p9, %p1143_p2 }
  0x35   : > { %1153 = shalt.err (!%p1150_p10)
}
  0x36   : > { %s1634_s3 = sld [smem:[#allocation22_spill]]  ;;  %s1315_s18 = smov [#allocation12]  }
  0x37   : > { %s310_s19 = sshll.u32 %s1315_s18, 4  ;;  %s311_s19 = int_to_ptr.vmem [resolvable:$true] %s310_s19 }
  0x38   : > { %s1165_s21 = scalar_lea.vmem %s311_s19, 1024  ;;  %p1173_p0 = scmp.lt.s32.totalorder %s311_s19, %s311_s19 }
  0x39   : > { %p1166_p11 = scmp.ne.s32.totalorder %s311_s19, %s1165_s21  ;;  %p1174_p2 = scmp.lt.s32.totalorder %s1165_s21, %s1165_s21 }
  0x3b   : > { %p1168_p12 = pnand %p1166_p11, %p1078_p7  ;;  %p1175_p5 = por %p1174_p2, %p1173_p0 }
  0x3c   : > { %989 = dma.hbm_to_vmem [thread:$0]  (!%p1409_p6), %s1634_s3, 1024, %s1413_s22, [#allocation8], %s1313_s24, %s1313_s24, %s1314_s25  }
  0x3d   : > { %p1169_p13 = pneg %p1168_p12 }
  0x3f   : > { %p1176_p8 = pnand %p1175_p5, %p1169_p13 }
  0x41   : > { %1179 = shalt.err (!%p1176_p8)
}
  0x42   : > { %995 = dma.hbm_to_vmem [thread:$0]  (!%p1409_p6), %s1618_s6, 1024, %s311_s19, [#allocation11], %s1313_s24, %s1313_s24, %s1314_s25  }
  0x43   : > { %s849_s20 = sadd.s32 4294967294, %s1308_s14   ;;  %s1465_s26 = sadd.s32 1, %s1308_s14  }
  0x44   : > { %s55_s27 = ssub.s32 %s1308_s14, %s1465_s26  ;;  %s58_s28 = sadd.s32 1, %s1304_s13 }
  0x45   : > { %p56_p7 = scmp.eq.s32.totalorder %s55_s27, 0  ;;  %p65_p9 = scmp.ne.s32.totalorder %s1304_s13, %s1300_s12 }
  0x46   : > { %p66_p10 = scmp.eq.s32.totalorder %s1308_s14, 0  ;;  %p71_p11 = scmp.ne.s32.totalorder %s1300_s12, %s1296_s11 }
  0x47   : > { %s1476_s29 = scalar_select %p56_p7, %s1304_s13, %s58_s28  }
  0x48   : > { %p1478_p12 = por %p66_p10, %p65_p9  ;;  %p1484_p6 = por %p1623_p1, %p71_p11 }
  0x49   : > { %p1622_p13 = scmp.eq.s32.totalorder %s1395_s16, 5  ;;  %p227_p0 = scmp.eq.s32.totalorder %s849_s20, 5 }
  0x4a   : > { %s1636_s24 = scalar_select %p1484_p6, 1, 0 }
  0x4b   : > { %p1008_p2 = scmp.lt.s32.totalorder %s1308_s14, 6  ;;  %s327_s25 = sand.u32 1, %s1304_s13  }
  0x4c   : > { %p1493_p5 = por %p1622_p13, %p65_p9  ;;  %p1497_p8 = por %p227_p0, %p71_p11 }
  0x4d   : > { %s856_s15 = sshll.u32 %s327_s25, 2  ;;  %s857_s18 = sshll.u32 %s1308_s14, 6 }
  0x4e   : > { %s1637_s10 = scalar_select %p1493_p5, 1, 0 }
  0x4f   : > { %s1638_s0 = scalar_select %p1497_p8, 1, 0 }
  0x50   : > { %s1505_s22 = scalar_lea.hbm %s1613_s1, %s857_s18  ;;  %s331_s23 = scalar_lea.vmem [#allocation4], %s856_s15 }
  0x51   : > { %s338_s20 = sshll.u32 %s331_s23, 4  ;;  %p1509_p7 = pnand %p1008_p2, %p1478_p12  ;;  %s339_s20 = int_to_ptr.vmem [resolvable:$true] %s338_s20 }
  0x52   : > { %s328_s28 = scalar_lea.sflag [#allocation5], %s327_s25  ;;  %s1180_s2 = scalar_lea.hbm %s1505_s22, 64 }
  0x53   : > { %p1181_p9 = scmp.ne.s32.totalorder %s1505_s22, %s1180_s2  ;;  %p1182_p10 = pneg %p1509_p7 }
  0x54   : > { %s1185_s21 = scalar_lea.hbm %s1613_s1, 384  ;;  %p1186_p13 = scmp.lt.s32.totalorder %s1505_s22, %s1613_s1 }
  0x55   : > { %p1183_p11 = pnand %p1182_p10, %p1181_p9  ;;  %p1187_p12 = scmp.lt.s32.totalorder %s1185_s21, %s1180_s2 }
  0x57   : > { %p1184_p0 = pneg %p1183_p11  ;;  %p1188_p2 = por %p1187_p12, %p1186_p13 }
  0x59   : > { %p1189_p3 = pnand %p1188_p2, %p1184_p0 }
  0x5b   : > { %1192 = shalt.err (!%p1189_p3)
}
  0x5c   : > { %s1193_s30 = scalar_lea.vmem %s339_s20, 64  ;;  %s1316_s25 = smov [#allocation4]  }
  0x5d   : > { %p1194_p1 = scmp.ne.s32.totalorder %s339_s20, %s1193_s30  ;;  %s1198_s3 = sshll.u32 %s1316_s25, 4  ;;  %s1199_s3 = int_to_ptr.vmem [resolvable:$false] %s1198_s3 }
  0x5e   : > { %s1200_s4 = scalar_lea.vmem %s1199_s3, 128  ;;  %p1201_p9 = scmp.lt.s32.totalorder %s339_s20, %s1199_s3 }
  0x5f   : > { %p1196_p8 = pnand %p1194_p1, %p1182_p10  ;;  %p1202_p11 = scmp.lt.s32.totalorder %s1200_s4, %s1193_s30 }
  0x61   : > { %p1197_p5 = pneg %p1196_p8  ;;  %p1203_p6 = por %p1202_p11, %p1201_p9 }
  0x63   : > { %p1204_p4 = pnand %p1203_p6, %p1197_p5 }
  0x65   : > { %1207 = shalt.err (!%p1204_p4)
}
  0x66   : > { %999 = dma.hbm_to_vmem [thread:$0]  (!%p1509_p7), %s1505_s22, 64, %s339_s20, %s328_s28  }
  0x67   : > { %p1640_p13 = scmp.ne.s32.totalorder %s1630_s17, 0 }
  0x68   : > { %s1530_s2 = sand.u32 (!%p1640_p13), 1, %s1300_s12   ;;  %p1641_p1 = scmp.ne.s32.totalorder (!%p1640_p13), %s1636_s24, 0 }
  0x69   : > { %347 = sbr.rel (%p1640_p13) target bundleno = 619 (0x26b), region = 52  ;;  %s859_s18 = sshll.u32 (!%p1640_p13), %s1530_s2, 2 }
  0x6a   : > { %s350_s19 = scalar_lea.sflag (!%p1640_p13), [#allocation5], %s1530_s2  ;;  %s353_s3 = scalar_lea.vmem (!%p1640_p13), [#allocation4], %s859_s18 }
  0x6e   : > { %1275 = dma.done.wait (%p1641_p1), %s350_s19, 64  }
  0x6f   : > { %1277 = vsyncadd (%p1641_p1), %s350_s19, 4294967232  ;;  %p1642_p3 = scmp.eq.s32.totalorder %s1395_s16, 0 }
  0x71   : > { %1279 = dma.done.wait (%p1642_p3), [#allocation8], 1152   ;;  %p1643_p4 = pmov %p1642_p3 }
  0x72   : > { %p1644_p6 = pmov %p1642_p3 }
  0x73   : > { %1281 = vsyncadd (%p1643_p4), [#allocation8], 4294966144 }
  0x74   : > { %1283 = dma.done.wait (%p1644_p6), [#allocation11], 1152   ;;  %p1645_p5 = pmov %p1642_p3 }
  0x75   : > { %s864_s4 = sshll.u32 %s1530_s2, 3  ;;  %s1547_s17 = sld [smem:[#allocation3]] }
  0x76   : > { %1285 = vsyncadd (%p1645_p5), [#allocation11], 4294966144  ;;  %s1549_s22 = scalar_lea.vmem [#allocation13], %s864_s4  ;;  %p1646_p8 = scmp.ne.s32.totalorder %s1395_s16, 0 }
  0x78   : > { %409 = sbr.rel (%p1646_p8) target bundleno = 127 (0x7f), region = 76 }
  0x7d   : > { %v410_v0 = vld [vmem:[#allocation10] sm:$0xff] }
  0x7e   : > { %411 = vst [vmem:[#allocation2] sm:$0xff] %v410_v0 }
  0x7f PF: > { %v1057_v1 = vld [vmem:[#allocation9 + $0x38] sm:$0xff]   ;;  %v1317_v2 = vmov 0.0   ;;  %v1058_v3 = vld [vmem:[#allocation9 + $0x30] sm:$0xff]   ;;  %vm1318_vm0 = vmmov 0   ;;  %v1059_v4 = vld [vmem:[#allocation9 + $0x28] sm:$0xff]   ;;  %vm530_vm1 = vcmask 130048   ;;  %v574_v28 = vstv %s1547_s17 }
  0x80   : > { %913 = vmatprep.subr.bf16.mxu0 %v1317_v2  ;;  %933 = vmatprep.subr.bf16.mxu1 %v1317_v2  ;;  %v1063_v5 = vld [vmem:[#allocation7] sm:$0xff]   ;;  %v413_v6 = vld [vmem:[%s353_s3] sm:$0xf]  ;;  %v1060_v7 = vld [vmem:[#allocation9 + $0x20] sm:$0xff]   ;;  %s521_s24 = ssub.f32 1.0, %s1547_s17  ;;  %p886_p7 = scmp.ne.s32.totalorder %s1395_s16, 5 }
  0x81   : > { %914 = vmatpush3.bf16.msra.mxu0 %v1057_v1  ;;  %935 = vmatprep.mubr.msk.bf16.mxu1 %vm1318_vm0, %v1317_v2  ;;  %v1061_v8 = vld [vmem:[#allocation9 + $0x18] sm:$0xff]   ;;  %v1062_v9 = vld [vmem:[#allocation9 + $0x10] sm:$0xff]   ;;  %v1064_v10 = vld [vmem:[#allocation9 + $0x8] sm:$0xff]  }
  0x82   : > { %915 = vmatprep.subr.bf16.mxu0 %v1317_v2  ;;  %929 = vmatprep.mubr.msk.bf16.mxu0 %vm1318_vm0, %v1317_v2  ;;  %v1065_v11 = vld [vmem:[#allocation9] sm:$0xff]   ;;  %v1067_v15 = vld [vmem:[#allocation12 + $0x30] sm:$0xff]   ;;  %v1068_v16 = vld [vmem:[#allocation12 + $0x28] sm:$0xff]   ;;  %v522_v26 = vstv %s521_s24 }
  0x83   : > { %934 = vmatpush3.bf16.msra.mxu1 %v1063_v5  ;;  %v1066_v14 = vld [vmem:[#allocation12 + $0x38] sm:$0xff]   ;;  %v1069_v17 = vld [vmem:[#allocation12 + $0x20] sm:$0xff]   ;;  %v1071_v19 = vld [vmem:[#allocation12 + $0x10] sm:$0xff]  }
  0x84   : > { %939 = vmatprep.subr.bf16.mxu1 %v1317_v2  ;;  %v1070_v18 = vld [vmem:[#allocation12 + $0x18] sm:$0xff]   ;;  %v1072_v20 = vld [vmem:[#allocation12 + $0x8] sm:$0xff]   ;;  %v1073_v21 = vld [vmem:[#allocation12] sm:$0xff]  }
  0x85   : > { %916 = vmatpush3.bf16.msra.mxu0 %v1058_v3  ;;  %v412_v12 = vld [vmem:[#allocation2] sm:$0xff] }
  0x86   : > { %917 = vmatprep.subr.bf16.mxu0 %v1317_v2  ;;  %936 = vmatmul.mubr.msk.bf16.vlgmr.msra.gmra.mxu1 %vm530_vm1, %v413_v6  ;;  %v416_v13 = vpack.c.bf16 %v412_v12, %v412_v12  ;;  %v523_v29 = vmul.f32 %v522_v26, %v412_v12  ;;  %v876_v33 = vld [vmem:[%s1617_s5] ss:$0 sm:$0xff] }
  0x87   : > { %955 = vmatprep.mubr.msk.bf16.mxu1 %vm1318_vm0, %v1317_v2  ;;  %940 = vmatpush3.bf16.msra.mxu1 %v1066_v14  ;;  %v877_v40 = vld [vmem:[%s1619_s7] ss:$0 sm:$0xff] }
  0x88   : > { %941 = vmatprep.subr.bf16.mxu1 %v1317_v2 }
  0x89   : > { %918 = vmatpush3.bf16.msra.mxu0 %v1059_v4 }
  0x8a   : > { %919 = vmatprep.subr.bf16.mxu0 %v1317_v2 }
  0x8b   : > { %942 = vmatpush3.bf16.msra.mxu1 %v1067_v15 }
  0x8c   : > { %943 = vmatprep.subr.bf16.mxu1 %v1317_v2 }
  0x8d   : > { %920 = vmatpush3.bf16.msra.mxu0 %v1060_v7 }
  0x8e   : > { %921 = vmatprep.subr.bf16.mxu0 %v1317_v2 }
  0x8f   : > { %944 = vmatpush3.bf16.msra.mxu1 %v1068_v16 }
  0x90   : > { %945 = vmatprep.subr.bf16.mxu1 %v1317_v2 }
  0x91   : > { %922 = vmatpush3.bf16.msra.mxu0 %v1061_v8 }
  0x92   : > { %923 = vmatprep.subr.bf16.mxu0 %v1317_v2 }
  0x93   : > { %946 = vmatpush3.bf16.msra.mxu1 %v1069_v17 }
  0x94   : > { %947 = vmatprep.subr.bf16.mxu1 %v1317_v2 }
  0x95   : > { %924 = vmatpush3.bf16.msra.mxu0 %v1062_v9 }
  0x96   : > { %925 = vmatprep.subr.bf16.mxu0 %v1317_v2 }
  0x97   : > { %948 = vmatpush3.bf16.msra.mxu1 %v1070_v18 }
  0x98   : > { %949 = vmatprep.subr.bf16.mxu1 %v1317_v2 }
  0x99   : > { %926 = vmatpush3.bf16.msra.mxu0 %v1064_v10 }
  0x9a   : > { %927 = vmatprep.subr.bf16.mxu0 %v1317_v2 }
  0x9b   : > { %950 = vmatpush3.bf16.msra.mxu1 %v1071_v19 }
  0x9c   : > { %951 = vmatprep.subr.bf16.mxu1 %v1317_v2 }
  0x9d   : > { %928 = vmatpush3.bf16.msra.mxu0 %v1065_v11 }
  0x9f   : > { %952 = vmatpush3.bf16.msra.mxu1 %v1072_v20 }
  0xa0   : > { %930 = vmatmul.mubr.bf16.vlgmr.msra.gmra.mxu0 %v416_v13  ;;  %953 = vmatprep.subr.bf16.mxu1 %v1317_v2 }
  0xa3   : > { %954 = vmatpush3.bf16.msra.mxu1 %v1073_v21 }
 0x146   : > { %v568_v22 = vpop.f32.mrf.mxu1 }
 0x148   : > { %v937_v23 = vpop.f32.mrf.mxu1 }
 0x14a   : > { %v571_v24 = vpop.f32.mrf.mxu1 }
 0x14c   : > { %v938_v25 = vpop.f32.mrf.mxu1 }
 0x160   : > { %v515_v27 = vpop.f32.mrf.mxu0 }
 0x161   : > { %v569_v30 = vadd.f32 %v568_v22, %v515_v27 }
 0x162   : > { %v931_v31 = vpop.f32.mrf.mxu0 }
 0x163   : > { %v575_v32 = vmul.f32 %v574_v28, %v569_v30 }
 0x164   : > { %v518_v34 = vpop.f32.mrf.mxu0 }
 0x165   : > { %v576_v35 = vadd.f32 %v575_v32, %v523_v29 }
 0x166   : > { %v932_v36 = vpop.f32.mrf.mxu0 }
 0x167   : > { %v584_v37 = vadd.f32 %v876_v33, %v576_v35 }
 0x169   : > { %1074 = vtanh.f32 %v584_v37 }
 0x176   : > { %v1075_v38 = vpop.eup %1074 }
 0x177   : > { %586 = vst [vmem:[#allocation2] sm:$0xff] %v1075_v38  ;;  %v587_v39 = vpack.c.bf16 %v1075_v38, %v1075_v38 }
 0x179   : > { %956 = vmatmul.mubr.bf16.vlgmr.msra.gmra.mxu1 %v587_v39 }
 0x239   : > { %v693_v41 = vpop.f32.mrf.mxu1 }
 0x23a   : > { %v694_v42 = vadd.f32 %v877_v40, %v693_v41 }
 0x23b   : > { %v957_v43 = vpop.f32.mrf.mxu1  ;;  %703 = sbr.rel (%p886_p7) target bundleno = 577 (0x241), region = 80 }
 0x23c   : > { %699 = vst [vmem:[%s1549_s22] sm:$0xff] %v694_v42 }
 0x23d   : > { %v696_v44 = vpop.f32.mrf.mxu1 }
 0x23f   : > { %v958_v45 = vpop.f32.mrf.mxu1 }
 0x240   : > { %704 = vst [vmem:[#allocation14] sm:$0xff] %v1075_v38 }
 0x241 PF: > { %s888_s15 = sshll.u32 %s1395_s16, 7  ;;  %s719_s18 = sshll.u32 %s1549_s22, 4  ;;  %s720_s18 = int_to_ptr.vmem [resolvable:$true] %s719_s18 }
 0x242   : > { %s717_s25 = scalar_lea.hbm %s1620_s8, %s888_s15  ;;  %s706_s19 = scalar_lea.sflag [#allocation6], %s1530_s2 }
 0x243   : > { %s1208_s3 = scalar_lea.vmem %s720_s18, 128  ;;  %p1647_p0 = scmp.ne.s32.totalorder %s1637_s10, 0 }
 0x244   : > { %p1209_p10 = scmp.ne.s32.totalorder %s720_s18, %s1208_s3  ;;  %s1319_s4 = smov [#allocation13]  }
 0x245   : > { %s1212_s17 = sshll.u32 %s1319_s4, 4  ;;  %s1213_s17 = int_to_ptr.vmem [resolvable:$false] %s1212_s17 }
 0x246   : > { %p1210_p12 = pnand %p1209_p10, %p1647_p0  ;;  %s1214_s24 = scalar_lea.vmem %s1213_s17, 256 }
 0x247   : > { %p1215_p9 = scmp.lt.s32.totalorder %s720_s18, %s1213_s17  ;;  %p1216_p11 = scmp.lt.s32.totalorder %s1214_s24, %s1208_s3 }
 0x248   : > { %p1211_p2 = pneg %p1210_p12 }
 0x249   : > { %p1217_p13 = por %p1216_p11, %p1215_p9 }
 0x24b   : > { %p1218_p1 = pnand %p1217_p13, %p1211_p2 }
 0x24d   : > { %1221 = shalt.err (!%p1218_p1)
}
 0x24e   : > { %s1222_s20 = scalar_lea.hbm %s717_s25, 128  ;;  %s1226_s27 = scalar_lea.hbm %s1620_s8, 768 }
 0x24f   : > { %p1223_p3 = scmp.ne.s32.totalorder %s717_s25, %s1222_s20  ;;  %p1227_p5 = scmp.lt.s32.totalorder %s717_s25, %s1620_s8 }
 0x250   : > { %p1228_p8 = scmp.lt.s32.totalorder %s1226_s27, %s1222_s20 }
 0x251   : > { %p1224_p4 = pnand %p1223_p3, %p1647_p0 }
 0x252   : > { %p1229_p7 = por %p1228_p8, %p1227_p5 }
 0x253   : > { %p1225_p6 = pneg %p1224_p4 }
 0x255   : > { %p1230_p10 = pnand %p1229_p7, %p1225_p6 }
 0x257   : > { %1233 = shalt.err (!%p1230_p10)
}
 0x258   : > { %977 = dma.vmem_to_hbm [thread:$0]  (%p1647_p0), %s720_s18, 128, %s717_s25, %s706_s19  }
 0x259   : > { %s1320_s15 = smov [#allocation14]   ;;  %p1648_p2 = scmp.eq.s32.totalorder %s1395_s16, 5 }
 0x25a   : > { %s730_s23 = sshll.u32 %s1320_s15, 4  ;;  %s731_s23 = int_to_ptr.vmem [resolvable:$true] %s730_s23 }
 0x25b   : > { %s1234_s30 = scalar_lea.vmem %s731_s23, 128  ;;  %p1241_p13 = scmp.lt.s32.totalorder %s731_s23, %s731_s23 }
 0x25c   : > { %p1235_p12 = scmp.ne.s32.totalorder %s731_s23, %s1234_s30  ;;  %p1242_p1 = scmp.lt.s32.totalorder %s1234_s30, %s1234_s30 }
 0x25e   : > { %p1236_p9 = pnand %p1235_p12, %p1648_p2  ;;  %p1243_p3 = por %p1242_p1, %p1241_p13 }
 0x260   : > { %p1237_p11 = pneg %p1236_p9 }
 0x262   : > { %p1244_p4 = pnand %p1243_p3, %p1237_p11 }
 0x264   : > { %1247 = shalt.err (!%p1244_p4)
}
 0x265   : > { %p1649_p6 = pmov %p1648_p2  ;;  %p1650_p0 = pmov %p1648_p2 }
 0x267   : > { %979 = dma.vmem_to_hbm [thread:$0]  (%p1649_p6), %s731_s23, 128, %s1621_s9, [#allocation15]  }
 0x268   : > { %1287 = dma.done.wait (%p1650_p0), [#allocation15], 128   ;;  %p1651_p5 = pmov %p1650_p0 }
 0x26a   : > { %1289 = vsyncadd (%p1651_p5), [#allocation15], 4294967168 }
 0x26b PF: > { %p1015_p8 = scmp.ge.s32.totalorder %s1308_s14, 2  ;;  %s746_s10 = sand.u32 1, %s1296_s11  }
 0x26c   : > { %p1652_p7 = scmp.ne.s32.totalorder %s1638_s0, 0  ;;  %s747_s25 = scalar_lea.sflag [#allocation6], %s746_s10 }
 0x26e   : > { %p1001_p10 = pnand %p1015_p8, %p1652_p7 }
 0x270   : > { %p1002_p12 = pneg %p1001_p10 }
 0x272   : > { %1291 = dma.done.wait (%p1002_p12), %s747_s25, 128  }
 0x273   : > { %1293 = vsyncadd (%p1002_p12), %s747_s25, 4294967168  ;;  %p27_p2 = scmp.ge.s32.totalorder %s1465_s26, 8   ;;  %s1653_s11 = smov %s1300_s12 }
 0x274   : > { %s1654_s12 = smov %s1304_s13  ;;  %s1655_s13 = smov %s1476_s29 }
 0x275   : > { %s1656_s14 = smov %s1465_s26  ;;  %29 = sbr.rel (!%p27_p2) target bundleno = 13 (0xd), region = 129 }
 0x27a   :  { %752 = vsyncpa [#allocation5], 1 }
 0x27b   :  { %754 = vsyncpa [#allocation5 + $0x1], 1 }
 0x27c   :  { %755 = vsyncpa [#allocation8], 1 }
 0x27d   :  { %756 = vsyncpa [#allocation11], 1 }
 0x27e   :  { %757 = vsyncpa [#allocation6], 1 }
 0x27f   :  { %759 = vsyncpa [#allocation6 + $0x1], 1 }
 0x280   :  { %760 = vsyncpa [#allocation15], 1 }

</bundles_post_ra>
